<compile_context>
chip_gen: v7x
topology: tpu7x:2x2x1
jax: 0.10.0
libtpu: 0.0.40
codegen_flags: <defaults>
</compile_context>

<pallas_src>
import jax
import jax.numpy as jnp
from jax.experimental import pallas as pl
from jax.experimental.pallas import tpu as pltpu

EPS = 1e-5
LEAKY_SLOPE = 0.01


def _round_up(v, m):
    return ((v + m - 1) // m) * m


def _tile_vmem_bytes(Fin, Fout, tl, xbytes):
    """Rough double-buffered VMEM footprint of the larger of the two passes."""
    fin8 = _round_up(Fin, 8)
    fout8 = _round_up(Fout, 8)
    fin128 = _round_up(Fin, 128)
    # pass 1: 2x x-tile + 2x (S_x + Gram) output blocks (padded layouts)
    p1 = 2 * Fin * tl * xbytes + 2 * (fin8 * 128 + fin8 * fin128) * 4
    # pass 2: 2x x-tile + 2x out-tile + folded weight + shift
    p2 = (2 * Fin * tl * xbytes + 2 * Fout * tl * xbytes
          + fout8 * fin128 * xbytes + fout8 * 128 * 4)
    return max(p1, p2)


def _choose_l_tile(L_pad, Fin, Fout, xbytes, budget=40 * 2**20):
    """Largest lane-dense tile (multiple of 128, <= 2048) dividing L_pad that
    keeps the double-buffered working set within `budget`."""
    if L_pad < 128:
        return L_pad                    # tiny L: single full-extent tile
    for t in (2048, 1536, 1024, 768, 512, 384, 256, 128):
        if L_pad % t == 0 and _tile_vmem_bytes(Fin, Fout, t, xbytes) <= budget:
            return t
    return 128                          # L_pad is always a multiple of 128 here


# ---------------------------------------------------------------------------
# Pass 1: per-batch partial BN statistics directly from x.
#   S_x += sum_L x            (Fin, 1)
#   G   += x @ x^T            (Fin, Fin)   -- extra MXU matmul, no y written.
# Output blocks are indexed by n only, so they stay resident across the L axis
# (accumulator pattern); N axis is "parallel" so it can shard across cores.
# ---------------------------------------------------------------------------
def _stats_kernel(x_ref, sx_ref, g_ref):
    l = pl.program_id(1)

    @pl.when(l == 0)
    def _init():
        sx_ref[...] = jnp.zeros_like(sx_ref)
        g_ref[...] = jnp.zeros_like(g_ref)

    x = x_ref[0]                                              # (Fin, TL)
    sx_ref[0] += jnp.sum(x.astype(jnp.float32), axis=1, keepdims=True)
    g_ref[0] += jax.lax.dot_general(
        x, x,
        dimension_numbers=(((1,), (1,)), ((), ())),           # x @ x^T
        preferred_element_type=jnp.float32)


# ---------------------------------------------------------------------------
# Pass 2: fused conv(k=1) + BatchNorm + LeakyReLU.
#   BN scale and the conv bias are pre-folded into (W_fold, shift_fold), so the
#   hot loop is a single MXU matmul + broadcast add + select.
# ---------------------------------------------------------------------------
def _fused_conv_bn_act_kernel(x_ref, w_ref, sh_ref, o_ref):
    y = jnp.dot(w_ref[...], x_ref[0],
                preferred_element_type=jnp.float32) + sh_ref[...]
    o_ref[0] = jnp.where(y >= 0, y, LEAKY_SLOPE * y).astype(o_ref.dtype)


@jax.jit
def basic_conv1d(x_ncl, weight, bias, gamma, beta):
    """x_ncl: (N, Fin, L).  weight: (Fout, Fin, 1).  Returns (N, Fout, L)."""
    N, Fin, L = x_ncl.shape
    Fout = weight.shape[0]
    out_dtype = x_ncl.dtype
    xbytes = jnp.dtype(x_ncl.dtype).itemsize
    f32 = jnp.float32

    # Keep the lane axis a multiple of 128 (avoids masked vst partial stores).
    # Padded zero columns contribute nothing to S_x / G and are sliced off at
    # the end; true M = N*L is used for the statistics.
    L_pad = L if L < 128 else _round_up(L, 128)
    if L_pad != L:
        x_ncl = jnp.pad(x_ncl, ((0, 0), (0, 0), (0, L_pad - L)))
    TL = _choose_l_tile(L_pad, Fin, Fout, xbytes)
    nl = L_pad // TL
    M = N * L

    # 48 MiB cap: leaves headroom on v7x's 64 MiB/TC VMEM; plenty on v5e/v6e.
    vmem_limit = int(min(48 * 2**20,
                         max(32 * 2**20,
                             2 * _tile_vmem_bytes(Fin, Fout, TL, xbytes))))

    # ---- Pass 1: per-batch partial sums S_x and Gram G = x x^T ----
    sx_p, g_p = pl.pallas_call(
        _stats_kernel,
        out_shape=(
            jax.ShapeDtypeStruct((N, Fin, 1), f32),
            jax.ShapeDtypeStruct((N, Fin, Fin), f32),
        ),
        grid_spec=pltpu.PrefetchScalarGridSpec(
            num_scalar_prefetch=0,
            grid=(N, nl),
            in_specs=[pl.BlockSpec((1, Fin, TL), lambda n, l: (n, 0, l))],
            out_specs=(
                pl.BlockSpec((1, Fin, 1), lambda n, l: (n, 0, 0)),
                pl.BlockSpec((1, Fin, Fin), lambda n, l: (n, 0, 0)),
            ),
        ),
        compiler_params=pltpu.CompilerParams(
            dimension_semantics=("parallel", "arbitrary"),
            vmem_limit_bytes=vmem_limit,
        ),
        cost_estimate=pl.CostEstimate(
            flops=2 * N * L_pad * Fin * Fin + N * L_pad * Fin,
            transcendentals=0,
            bytes_accessed=xbytes * N * Fin * L_pad
                           + 4 * N * (Fin + Fin * Fin),
        ),
    )(x_ncl)

    # ---- Tiny analytic fold (plain JAX): batch stats of y = W x + b ----
    S_x = jnp.sum(sx_p, axis=0)[:, 0]              # (Fin,)
    G = jnp.sum(g_p, axis=0)                       # (Fin, Fin)
    w = weight[:, :, 0].astype(f32)                # (Fout, Fin)
    b = bias.astype(f32)                           # (Fout,)
    wsx = w @ S_x                                  # (Fout,)
    m = jnp.float32(M)
    sum_y = wsx + b * m
    sum_y2 = jnp.sum((w @ G) * w, axis=1) + 2.0 * b * wsx + b * b * m
    mean = sum_y / m
    # Biased (training-mode) variance; clamp against single-pass cancellation.
    # TODO(synk): for very large N*L a centered two-pass variance is more robust
    # than E[y^2] - mean^2.
    var = jnp.maximum(sum_y2 / m - mean * mean, 0.0)
    scale = gamma.astype(f32) * jax.lax.rsqrt(var + EPS)
    shift = beta.astype(f32) - mean * scale
    w_fold = (w * scale[:, None]).astype(x_ncl.dtype)    # BN folded into conv W
    shift_fold = (shift + b * scale).reshape(Fout, 1)    # conv bias folded in

    # ---- Pass 2: fused conv(k=1) + BN + LeakyReLU, fully parallel grid ----
    out = pl.pallas_call(
        _fused_conv_bn_act_kernel,
        out_shape=jax.ShapeDtypeStruct((N, Fout, L_pad), out_dtype),
        grid_spec=pltpu.PrefetchScalarGridSpec(
            num_scalar_prefetch=0,
            grid=(N, nl),
            in_specs=[
                pl.BlockSpec((1, Fin, TL), lambda n, l: (n, 0, l)),   # x
                pl.BlockSpec((Fout, Fin), lambda n, l: (0, 0)),       # W_fold
                pl.BlockSpec((Fout, 1), lambda n, l: (0, 0)),         # shift
            ],
            out_specs=pl.BlockSpec((1, Fout, TL), lambda n, l: (n, 0, l)),
        ),
        compiler_params=pltpu.CompilerParams(
            dimension_semantics=("parallel", "parallel"),
            vmem_limit_bytes=vmem_limit,
        ),
        cost_estimate=pl.CostEstimate(
            flops=2 * N * L_pad * Fin * Fout + 3 * N * L_pad * Fout,
            transcendentals=0,
            bytes_accessed=xbytes * N * L_pad * (Fin + Fout)
                           + 4 * Fout * (Fin + 1),
        ),
    )(x_ncl, w_fold, shift_fold)

    return out[:, :, :L]


if __name__ == "__main__":
    # Small shapes consistent with the module: batch=2, Fin=4, Fout=8, L=16.
    N, Fin, Fout, L = 2, 4, 8, 16

    key = jax.random.PRNGKey(0)
    kx, kw, kb = jax.random.split(key, 3)

    x = jax.random.normal(kx, (N, Fin, L), dtype=jnp.float32)
    # Deterministic in-script parameters (shapes match nn.Conv1d / nn.BatchNorm1d).
    weight = jax.random.normal(kw, (Fout, Fin, 1), dtype=jnp.float32) * 0.1
    bias = jax.random.normal(kb, (Fout,), dtype=jnp.float32) * 0.1
    gamma = jnp.ones((Fout,), dtype=jnp.float32)   # BN weight init
    beta = jnp.zeros((Fout,), dtype=jnp.float32)   # BN bias init

    out = basic_conv1d(x, weight, bias, gamma, beta)
    out = jax.block_until_ready(out)

    assert out.shape == (N, Fout, L), out.shape
    assert bool(jnp.all(jnp.isfinite(out)))

    # Reference check: plain-JAX conv(k=1) + training-mode BN + LeakyReLU.
    y_ref = jnp.einsum("oi,nil->nol", weight[:, :, 0], x) + bias[None, :, None]
    mean_r = jnp.mean(y_ref, axis=(0, 2), keepdims=True)
    var_r = jnp.mean((y_ref - mean_r) ** 2, axis=(0, 2), keepdims=True)
    z_ref = (y_ref - mean_r) * jax.lax.rsqrt(var_r + EPS)
    z_ref = z_ref * gamma[None, :, None] + beta[None, :, None]
    ref = jnp.where(z_ref >= 0, z_ref, LEAKY_SLOPE * z_ref)
    assert bool(jnp.allclose(out, ref, rtol=1e-3, atol=1e-3)), (
        float(jnp.max(jnp.abs(out - ref))))

    print("KERNEL_OK")
</pallas_src>

<mosaic_0001>
module attributes {stable_mosaic.version = 11 : i64} {
  func.func @_stats_kernel(%arg0: i32, %arg1: i32, %arg2: memref<1x4x16xf32, #tpu.memory_space<vmem>>, %arg3: memref<1x4x1xf32, #tpu.memory_space<vmem>>, %arg4: memref<1x4x4xf32, #tpu.memory_space<vmem>>) attributes {dimension_semantics = [#tpu.dimension_semantics<parallel>, #tpu.dimension_semantics<arbitrary>], iteration_bounds = array<i64: 2, 1>, scalar_prefetch = 0 : i64, scratch_operands = 0 : i64, tpu.core_type = #tpu.core_type<tc>, window_params = [{transform_indices = @transform_0, window_bounds = array<i64: 1, 4, 16>}, {transform_indices = @transform_1, window_bounds = array<i64: 1, 4, 1>}, {transform_indices = @transform_2, window_bounds = array<i64: 1, 4, 4>}]} {
    %c0_i32 = arith.constant 0 : i32
    %0 = arith.cmpi eq, %arg1, %c0_i32 : i32
    %1 = arith.extui %0 : i1 to i32
    %c0_i32_0 = arith.constant 0 : i32
    %2 = arith.cmpi ne, %1, %c0_i32_0 : i32
    scf.if %2 {
      %cst_16 = arith.constant 0.000000e+00 : f32
      %20 = vector.broadcast %cst_16 : f32 to vector<1x4x1xf32>
      %c0_17 = arith.constant 0 : index
      %c0_18 = arith.constant 0 : index
      %c0_19 = arith.constant 0 : index
      %21 = vector.load %arg3[%c0_17, %c0_18, %c0_19] : memref<1x4x1xf32, #tpu.memory_space<vmem>>, vector<1x4x1xf32>
      tpu.vector_store %arg3[%c0_17, %c0_18, %c0_19], %20 {strides = array<i32>} : memref<1x4x1xf32, #tpu.memory_space<vmem>>, vector<1x4x1xf32>,
      %cst_20 = arith.constant 0.000000e+00 : f32
      %22 = vector.broadcast %cst_20 : f32 to vector<1x4x4xf32>
      %c0_21 = arith.constant 0 : index
      %c0_22 = arith.constant 0 : index
      %c0_23 = arith.constant 0 : index
      %23 = vector.load %arg4[%c0_21, %c0_22, %c0_23] : memref<1x4x4xf32, #tpu.memory_space<vmem>>, vector<1x4x4xf32>
      tpu.vector_store %arg4[%c0_21, %c0_22, %c0_23], %22 {strides = array<i32>} : memref<1x4x4xf32, #tpu.memory_space<vmem>>, vector<1x4x4xf32>,
    } else {
    }
    %c0 = arith.constant 0 : index
    %c0_1 = arith.constant 0 : index
    %c0_2 = arith.constant 0 : index
    %3 = vector.load %arg2[%c0, %c0_1, %c0_2] : memref<1x4x16xf32, #tpu.memory_space<vmem>>, vector<1x4x16xf32>
    %4 = vector.shape_cast %3 : vector<1x4x16xf32> to vector<4x16xf32>
    %c0_3 = arith.constant 0 : index
    %c0_4 = arith.constant 0 : index
    %c0_5 = arith.constant 0 : index
    %5 = vector.load %arg3[%c0_3, %c0_4, %c0_5] : memref<1x4x1xf32, #tpu.memory_space<vmem>>, vector<1x4x1xf32>
    %6 = vector.shape_cast %5 : vector<1x4x1xf32> to vector<4x1xf32>
    %cst = arith.constant dense<0.000000e+00> : vector<4xf32>
    %7 = vector.multi_reduction <add>, %4, %cst [1] : vector<4x16xf32> to vector<4xf32>
    %8 = vector.shape_cast %7 : vector<4xf32> to vector<4x1xf32>
    %9 = arith.addf %6, %8 : vector<4x1xf32>
    %c0_6 = arith.constant 0 : index
    %c0_7 = arith.constant 0 : index
    %c0_8 = arith.constant 0 : index
    %10 = vector.load %arg3[%c0_6, %c0_7, %c0_8] : memref<1x4x1xf32, #tpu.memory_space<vmem>>, vector<1x4x1xf32>
    %11 = vector.shape_cast %10 : vector<1x4x1xf32> to vector<4x1xf32>
    %12 = vector.shape_cast %9 : vector<4x1xf32> to vector<1x4x1xf32>
    tpu.vector_store %arg3[%c0_6, %c0_7, %c0_8], %12 {strides = array<i32>} : memref<1x4x1xf32, #tpu.memory_space<vmem>>, vector<1x4x1xf32>,
    %c0_9 = arith.constant 0 : index
    %c0_10 = arith.constant 0 : index
    %c0_11 = arith.constant 0 : index
    %13 = vector.load %arg4[%c0_9, %c0_10, %c0_11] : memref<1x4x4xf32, #tpu.memory_space<vmem>>, vector<1x4x4xf32>
    %14 = vector.shape_cast %13 : vector<1x4x4xf32> to vector<4x4xf32>
    %cst_12 = arith.constant dense<0.000000e+00> : vector<4x4xf32>
    %15 = tpu.matmul %4, %4, %cst_12 {dimension_numbers = #tpu.dot_dimension_numbers<[1], [1], [0], [0], [0, 0, 1, 0], [], []>} : vector<4x16xf32>, vector<4x16xf32>, vector<4x4xf32> -> vector<4x4xf32>
    %16 = arith.addf %14, %15 : vector<4x4xf32>
    %c0_13 = arith.constant 0 : index
    %c0_14 = arith.constant 0 : index
    %c0_15 = arith.constant 0 : index
    %17 = vector.load %arg4[%c0_13, %c0_14, %c0_15] : memref<1x4x4xf32, #tpu.memory_space<vmem>>, vector<1x4x4xf32>
    %18 = vector.shape_cast %17 : vector<1x4x4xf32> to vector<4x4xf32>
    %19 = vector.shape_cast %16 : vector<4x4xf32> to vector<1x4x4xf32>
    tpu.vector_store %arg4[%c0_13, %c0_14, %c0_15], %19 {strides = array<i32>} : memref<1x4x4xf32, #tpu.memory_space<vmem>>, vector<1x4x4xf32>,
    return
  }
  func.func @transform_0(%arg0: i32, %arg1: i32) -> (i32, i32, i32) {
    %c0_i32 = arith.constant 0 : i32
    %c0_i32_0 = arith.constant 0 : i32
    return %arg0, %c0_i32, %arg1 : i32, i32, i32
  }
  func.func @transform_1(%arg0: i32, %arg1: i32) -> (i32, i32, i32) {
    %c0_i32 = arith.constant 0 : i32
    %c0_i32_0 = arith.constant 0 : i32
    %c0_i32_1 = arith.constant 0 : i32
    return %arg0, %c0_i32, %c0_i32_0 : i32, i32, i32
  }
  func.func @transform_2(%arg0: i32, %arg1: i32) -> (i32, i32, i32) {
    %c0_i32 = arith.constant 0 : i32
    %c0_i32_0 = arith.constant 0 : i32
    %c0_i32_1 = arith.constant 0 : i32
    return %arg0, %c0_i32, %c0_i32_0 : i32, i32, i32
  }
}

module attributes {stable_mosaic.version = 11 : i64} {
  func.func @_fused_conv_bn_act_kernel(%arg0: i32, %arg1: i32, %arg2: memref<1x4x16xf32, #tpu.memory_space<vmem>>, %arg3: memref<8x4xf32, #tpu.memory_space<vmem>>, %arg4: memref<8x1xf32, #tpu.memory_space<vmem>>, %arg5: memref<1x8x16xf32, #tpu.memory_space<vmem>>) attributes {dimension_semantics = [#tpu.dimension_semantics<parallel>, #tpu.dimension_semantics<parallel>], iteration_bounds = array<i64: 2, 1>, scalar_prefetch = 0 : i64, scratch_operands = 0 : i64, tpu.core_type = #tpu.core_type<tc>, window_params = [{transform_indices = @transform_0, window_bounds = array<i64: 1, 4, 16>}, {pipeline_mode = #tpu.pipeline_mode<synchronous>, transform_indices = @transform_1, window_bounds = array<i64: 8, 4>}, {pipeline_mode = #tpu.pipeline_mode<synchronous>, transform_indices = @transform_2, window_bounds = array<i64: 8, 1>}, {transform_indices = @transform_3, window_bounds = array<i64: 1, 8, 16>}]} {
    %c0 = arith.constant 0 : index
    %c0_0 = arith.constant 0 : index
    %0 = vector.load %arg3[%c0, %c0_0] : memref<8x4xf32, #tpu.memory_space<vmem>>, vector<8x4xf32>
    %c0_1 = arith.constant 0 : index
    %c0_2 = arith.constant 0 : index
    %c0_3 = arith.constant 0 : index
    %1 = vector.load %arg2[%c0_1, %c0_2, %c0_3] : memref<1x4x16xf32, #tpu.memory_space<vmem>>, vector<1x4x16xf32>
    %2 = vector.shape_cast %1 : vector<1x4x16xf32> to vector<4x16xf32>
    %cst = arith.constant dense<0.000000e+00> : vector<8x16xf32>
    %3 = tpu.matmul %0, %2, %cst {dimension_numbers = #tpu.dot_dimension_numbers<[1], [0], [0], [1], [0, 0, 1, 1], [], []>} : vector<8x4xf32>, vector<4x16xf32>, vector<8x16xf32> -> vector<8x16xf32>
    %c0_4 = arith.constant 0 : index
    %c0_5 = arith.constant 0 : index
    %4 = vector.load %arg4[%c0_4, %c0_5] : memref<8x1xf32, #tpu.memory_space<vmem>>, vector<8x1xf32>
    %5 = vector.broadcast %4 : vector<8x1xf32> to vector<8x16xf32>
    %6 = arith.addf %3, %5 : vector<8x16xf32>
    %cst_6 = arith.constant 0.000000e+00 : f32
    %7 = vector.broadcast %cst_6 : f32 to vector<8x16xf32>
    %8 = arith.cmpf oge, %6, %7 : vector<8x16xf32>
    %cst_7 = arith.constant 0.00999999977 : f32
    %9 = vector.broadcast %cst_7 : f32 to vector<8x16xf32>
    %10 = arith.mulf %9, %6 : vector<8x16xf32>
    %11 = arith.select %8, %6, %10 : vector<8x16xi1>, vector<8x16xf32>
    %c0_8 = arith.constant 0 : index
    %c0_9 = arith.constant 0 : index
    %c0_10 = arith.constant 0 : index
    %12 = vector.load %arg5[%c0_8, %c0_9, %c0_10] : memref<1x8x16xf32, #tpu.memory_space<vmem>>, vector<1x8x16xf32>
    %13 = vector.shape_cast %12 : vector<1x8x16xf32> to vector<8x16xf32>
    %14 = vector.shape_cast %11 : vector<8x16xf32> to vector<1x8x16xf32>
    tpu.vector_store %arg5[%c0_8, %c0_9, %c0_10], %14 {strides = array<i32>} : memref<1x8x16xf32, #tpu.memory_space<vmem>>, vector<1x8x16xf32>,
    return
  }
  func.func @transform_0(%arg0: i32, %arg1: i32) -> (i32, i32, i32) {
    %c0_i32 = arith.constant 0 : i32
    %c0_i32_0 = arith.constant 0 : i32
    return %arg0, %c0_i32, %arg1 : i32, i32, i32
  }
  func.func @transform_1(%arg0: i32, %arg1: i32) -> (i32, i32) {
    %c0_i32 = arith.constant 0 : i32
    %c0_i32_0 = arith.constant 0 : i32
    %c0_i32_1 = arith.constant 0 : i32
    return %c0_i32, %c0_i32_0 : i32, i32
  }
  func.func @transform_2(%arg0: i32, %arg1: i32) -> (i32, i32) {
    %c0_i32 = arith.constant 0 : i32
    %c0_i32_0 = arith.constant 0 : i32
    %c0_i32_1 = arith.constant 0 : i32
    return %c0_i32, %c0_i32_0 : i32, i32
  }
  func.func @transform_3(%arg0: i32, %arg1: i32) -> (i32, i32, i32) {
    %c0_i32 = arith.constant 0 : i32
    %c0_i32_0 = arith.constant 0 : i32
    return %arg0, %c0_i32, %arg1 : i32, i32, i32
  }
}

</mosaic_0001>

<bundles_post_ra>
// kernel: basic_conv1d.2
= control target key start
LH: loop header
LB: loop body
LE: loop exit
PB: predicated region body
PF: predicated region fallthrough
CT: control target
= control target key end

     0   :  { %s449_s9 = smov 0   ;;  %s451_s10 = smov 0   ;;  %s487_s0 = inlined_call_operand.vmem [shape: f32[2,4,16], index: 0, kind: input, shape index: {}]   ;;  %s488_s1 = inlined_call_operand.vmem [shape: f32[2,4,1], index: 1, kind: output, shape index: {0}]   ;;  %s489_s2 = inlined_call_operand.vmem [shape: f32[2,4,4], index: 2, kind: output, shape index: {1}]  }
   0x1   :  { %s453_s11 = smov 0  }
   0x2 LB: > { %s25_s12 = sadd.s32 1, %s426_s10  ;;  %p367_p0 = scmp.ge.s32.totalorder %s430_s11, 1  ;;  %s430_s11 = sphi %s453_s11, %s13_s11   ;;  %s426_s10 = sphi %s451_s10, %s491_s10   ;;  %s422_s9 = sphi %s449_s9, %s490_s9  }
   0x3   : > { %p27_p1 = scmp.ge.s32.totalorder %s25_s12, 2  ;;  %p131_p2 = scmp.lt.s32.totalorder %s430_s11, 3 }
   0x5   : > { %s493_s12 = smov (%p27_p1, %s25_s12), 0  ;;  %p132_p3 = pnand %p367_p0, %p131_p2 }
   0x6   : > { %p158_p4 = scmp.lt.s32.totalorder (!%p132_p3), %s422_s9, 1  ;;  %v432_v0 = vmov (!%p132_p3), 0.0   ;;  %vm433_vm0 = vmmov (!%p132_p3), 0   ;;  %vm177_vm1 = vcmask (!%p132_p3), 3072   ;;  %vm191_vm2 = vcmask (!%p132_p3), 130048  }
   0x7   : > { %135 = sbr.rel (%p132_p3) target bundleno = 236 (0xec), region = 24  ;;  %377 = vmatprep.subr.mxu0 (!%p132_p3), %v432_v0  ;;  %379 = vmatprep.mubr.msk.f32.mxu0 (!%p132_p3), %vm433_vm0, %v432_v0  ;;  %vm183_vm3 = vcmask (!%p132_p3), 125952   ;;  %vm179_vm4 = vcmask (!%p132_p3), 27648  }
   0xe   : > { %s495_s9 = smov (!%p158_p4, %s422_s9), 1 }
   0xf   : > { %s368_s13 = sshll.u32 %s495_s9, 2 }
  0x10   : > { %s164_s16 = scalar_lea.vmem %s487_s0, %s368_s13  ;;  %s168_s19 = scalar_lea.vmem %s488_s1, %s368_s13 }
  0x11   : > { %v181_v1 = vld [vmem:[%s164_s16] sm:$0xf]  ;;  %178 = vst.msk [vmem:[%s168_s19] sm:$0xf] %vm177_vm1, %v432_v0  ;;  %s172_s22 = scalar_lea.vmem %s489_s2, %s368_s13 }
  0x12   : > { %378 = vmatpush3.xpose.msk.msra.mxu0 %vm191_vm2, %v181_v1  ;;  %v184_v2 = vsel %vm183_vm3, %v181_v1, 0.0  ;;  %180 = vst.msk [vmem:[%s172_s22] sm:$0xf] %vm179_vm4, %v432_v0 }
  0x13   : > { %185 = vadd.xlane.f32.xlu0 %v184_v2 }
  0x15   : > { %380 = vmatmul.mubr.msk.f32.vlgmr.msra.gmra.mrb[0].mxu0 %vm191_vm2, %v181_v1 }
  0x18   : > { %v182_v3 = vld [vmem:[%s168_s19] sm:$0xf] }
  0x19   : > { %v190_v6 = vld [vmem:[%s172_s22] sm:$0xf] }
  0xa0   : > { %v186_v4 = vpop.xlane.xlu0 %185 }
  0xa1   : > { %v187_v5 = vadd.f32 %v186_v4, %v182_v3 }
  0xa3   : > { %189 = vst.msk [vmem:[%s168_s19] sm:$0xf] %vm177_vm1, %v187_v5 }
  0xe8   : > { %v261_v7 = vpop.f32.mrb[0].mxu0 }
  0xe9   : > { %v265_v8 = vadd.f32 %v261_v7, %v190_v6  ;;  %v381_v9 = vpop.f32.mrb[1].mxu0 }
  0xeb   : > { %267 = vst.msk [vmem:[%s172_s22] sm:$0xf] %vm179_vm4, %v265_v8 }
  0xec PF: > { %s13_s11 = sadd.s32 1, %s430_s11   ;;  %s490_s9 = smov %s426_s10 }
  0xed   : > { %p10_p5 = scmp.ge.s32.totalorder %s13_s11, 4   ;;  %s491_s10 = smov %s493_s12 }
  0xef   :  { %12 = sbr.rel (!%p10_p5) target bundleno = 2 (0x2), region = 70 }

// kernel: basic_conv1d.3
= control target key start
LH: loop header
LB: loop body
LE: loop exit
PB: predicated region body
PF: predicated region fallthrough
CT: control target
= control target key end

     0   :  { %8 = vsyncpa [#allocation3], 0  ;;  %s669_s0 = inlined_call_operand.vmem [shape: f32[2,4,16], index: 0, kind: input, shape index: {}]   ;;  %s670_s1 = inlined_call_operand.vmem [shape: f32[8,4], index: 1, kind: input, shape index: {}]   ;;  %s671_s2 = inlined_call_operand.vmem [shape: f32[8,1], index: 2, kind: input, shape index: {}]   ;;  %s672_s3 = inlined_call_operand.hbm [shape: f32[2,8,16], index: 3, kind: output, shape index: {}]  }
   0x1   :  { %10 = vsyncpa [#allocation3 + $0x1], 0  ;;  %s551_s12 = smov 0   ;;  %s553_s13 = smov 0  }
   0x2   :  { %s555_s14 = smov 0   ;;  %s557_s15 = smov 0  }
   0x3   :  { %s559_s16 = smov 0   ;;  %s561_s17 = smov 0  }
   0x4 LB: > { %s368_s18 = sadd.s32 4294967295, %s525_s17   ;;  %s369_s19 = sadd.s32 4294967294, %s525_s17   ;;  %s525_s17 = sphi %s561_s17, %s16_s17   ;;  %s521_s16 = sphi %s559_s16, %s679_s16   ;;  %s517_s15 = sphi %s557_s15, %s678_s15   ;;  %s513_s14 = sphi %s555_s14, %s677_s14   ;;  %s509_s13 = sphi %s553_s13, %s676_s13   ;;  %s505_s12 = sphi %s551_s12, %s675_s12  }
   0x5   : > { %s28_s20 = sadd.s32 1, %s521_s16  ;;  %s107_s21 = sadd.s32 1, %s513_s14 }
   0x6   : > { %p30_p0 = scmp.ge.s32.totalorder %s28_s20, 2  ;;  %p117_p1 = scmp.ne.s32.totalorder %s513_s14, %s509_s13 }
   0x7   : > { %p118_p2 = scmp.eq.s32.totalorder %s368_s18, 1  ;;  %p123_p3 = scmp.ne.s32.totalorder %s509_s13, %s505_s12 }
   0x8   : > { %s681_s20 = smov (%p30_p0, %s28_s20), 0  ;;  %p124_p5 = scmp.eq.s32.totalorder %s369_s19, 1 }
   0x9   : > { %p591_p4 = por %p118_p2, %p117_p1  ;;  %s102_s23 = ssub.s32 %s521_s16, %s681_s20 }
   0xa   : > { %p372_p6 = scmp.ge.s32.totalorder %s525_s17, 1  ;;  %p105_p7 = scmp.eq.s32.totalorder %s102_s23, 0 }
   0xb   : > { %p598_p8 = por %p124_p5, %p123_p3  ;;  %p158_p9 = scmp.lt.s32.totalorder %s525_s17, 3 }
   0xc   : > { %s604_s25 = scalar_select %p105_p7, %s513_s14, %s107_s21  }
   0xd   : > { %p159_p10 = pnand %p372_p6, %p158_p9 }
   0xe   : > { %p184_p11 = scmp.lt.s32.totalorder (!%p159_p10), %s517_s15, 1  ;;  %v527_v0 = vmov (!%p159_p10), 0.0   ;;  %vm528_vm0 = vmmov (!%p159_p10), 0   ;;  %v193_v1 = vld [vmem:[%s671_s2] sm:$0xff] (!%p159_p10)  ;;  %v529_v2 = vmov (!%p159_p10), 0   ;;  %vm203_vm1 = vcmask (!%p159_p10), 1043456  }
   0xf   : > { %162 = sbr.rel (%p159_p10) target bundleno = 259 (0x103), region = 32  ;;  %383 = vmatprep.subr.mxu0 (!%p159_p10), %v527_v0  ;;  %385 = vmatprep.mubr.msk.f32.mxu0 (!%p159_p10), %vm528_vm0, %v527_v0  ;;  %v191_v3 = vld [vmem:[%s670_s1] sm:$0xff] (!%p159_p10)  ;;  %vm199_vm2 = vcmask (!%p159_p10), 31744   ;;  %s181_s8 = sand.u32 (!%p159_p10), 1, %s509_s13   ;;  %vm280_vm4 = vcmask (!%p159_p10), 130048  }
  0x10   : > { %446 = vset.pattern.permute.xlu0 (!%p159_p10), %v529_v2  ;;  %s373_s9 = sshll.u32 (!%p159_p10), %s181_s8, 3  ;;  %s378_s10 = sshll.u32 (!%p159_p10), %s517_s15, 7 }
  0x11   : > { %196 = vperm.xlu0 (!%p159_p10), %446, %v193_v1   ;;  %s183_s11 = scalar_lea.vmem (!%p159_p10), [#allocation2], %s373_s9  ;;  %s622_s23 = scalar_lea.hbm (!%p159_p10), %s672_s3, %s378_s10 }
  0x12   : > { %s297_s18 = sshll.u32 (!%p159_p10), %s183_s11, 4  ;;  %s283_s26 = scalar_lea.sflag (!%p159_p10), [#allocation3], %s181_s8  ;;  %s624_s18 = int_to_ptr.vmem [resolvable:$true] %s297_s18 }
  0x13   : > { %s447_s27 = scalar_lea.vmem (!%p159_p10), %s624_s18, 128 }
  0x14   : > { %p448_p12 = scmp.ne.s32.totalorder (!%p159_p10), %s624_s18, %s447_s27 }
  0x16   : > { %s185_s28 = scalar_select %p184_p11, %s517_s15, 1 }
  0x17   : > { %p449_p13 = pnand %p448_p12, %p591_p4  ;;  %s530_s15 = smov [#allocation2]  }
  0x18   : > { %s374_s29 = sshll.u32 %s185_s28, 2  ;;  %s451_s28 = sshll.u32 %s530_s15, 4  ;;  %s452_s28 = int_to_ptr.vmem [resolvable:$false] %s451_s28 }
  0x19   : > { %s190_s5 = scalar_lea.vmem %s669_s0, %s374_s29  ;;  %p450_p0 = pneg %p449_p13 }
  0x1a   : > { %v192_v4 = vld [vmem:[%s190_s5] sm:$0xf]  ;;  %s453_s29 = scalar_lea.vmem %s452_s28, 256  ;;  %p454_p1 = scmp.lt.s32.totalorder %s624_s18, %s452_s28 }
  0x1b   : > { %384 = vmatpush3.msk.msra.mxu0 %vm203_vm1, %v192_v4  ;;  %p455_p2 = scmp.lt.s32.totalorder %s453_s29, %s447_s27 }
  0x1c   : > { %386 = vmatmul.mubr.msk.f32.vlgmr.msra.gmra.mrb[0].mxu0 %vm199_vm2, %v191_v3 }
  0x1d   : > { %p456_p3 = por %p455_p2, %p454_p1 }
  0x1f   : > { %p457_p5 = pnand %p456_p3, %p450_p0 }
  0x90   : > { %v197_v5 = vpop.permute.xlu0 %196 }
  0xef   : > { %v273_v6 = vpop.f32.mrb[0].mxu0 }
  0xf0   : > { %v274_v7 = vadd.f32 %v273_v6, %v197_v5  ;;  %v387_v8 = vpop.f32.mrb[1].mxu0 }
  0xf2   : > { %vm277_vm3 = vcmp.ge.f32.partialorder %v274_v7, 0.0  ;;  %v278_v9 = vmul.f32 0.01, %v274_v7 }
  0xf4   : > { %v279_v10 = vsel %vm277_vm3, %v274_v7, %v278_v9 }
  0xf5   : > { %281 = vst.msk [vmem:[%s183_s11] sm:$0xff] %vm280_vm4, %v279_v10 }
  0xf6   : > { %460 = shalt.err (!%p457_p5)
}
  0xf7   : > { %s461_s30 = scalar_lea.hbm %s622_s23, 128  ;;  %s465_s6 = scalar_lea.hbm %s672_s3, 256 }
  0xf8   : > { %p462_p6 = scmp.ne.s32.totalorder %s622_s23, %s461_s30  ;;  %p466_p10 = scmp.lt.u32.totalorder %s622_s23, %s672_s3 }
  0xf9   : > { %p467_p11 = scmp.lt.u32.totalorder %s465_s6, %s461_s30  ;;  %p469_p13 = scmp.lt.u32.totalorder %s461_s30, %s622_s23 }
  0xfa   : > { %p463_p7 = pnand %p462_p6, %p591_p4 }
  0xfb   : > { %p468_p12 = por %p467_p11, %p466_p10 }
  0xfc   : > { %p464_p9 = pneg %p463_p7 }
  0xfd   : > { %p470_p0 = por %p469_p13, %p468_p12 }
  0xff   : > { %p471_p1 = pnand %p470_p0, %p464_p9 }
 0x101   : > { %474 = shalt.err (!%p471_p1)
}
 0x102   : > { %388 = dma.vmem_to_hbm [thread:$0]  (%p591_p4), %s624_s18, 128, %s622_s23, %s283_s26  }
 0x103 PF: > { %p394_p2 = scmp.ge.s32.totalorder %s525_s17, 2  ;;  %s309_s9 = sand.u32 1, %s505_s12  }
 0x104   : > { %s310_s10 = scalar_lea.sflag [#allocation3], %s309_s9 }
 0x105   : > { %p391_p3 = pnand %p394_p2, %p598_p8 }
 0x107   : > { %500 = dma.done.wait (!%p391_p3), %s310_s10, 128  }
 0x108   : > { %502 = vsyncadd (!%p391_p3), %s310_s10, 4294967168  ;;  %s16_s17 = sadd.s32 1, %s525_s17   ;;  %s675_s12 = smov %s509_s13 }
 0x109   : > { %p13_p5 = scmp.ge.s32.totalorder %s16_s17, 4   ;;  %s676_s13 = smov %s513_s14 }
 0x10a   : > { %s677_s14 = smov %s604_s25  ;;  %s678_s15 = smov %s521_s16 }
 0x10b   : > { %s679_s16 = smov %s681_s20  ;;  %15 = sbr.rel (!%p13_p5) target bundleno = 4 (0x4), region = 67 }
 0x112   :  { %315 = vsyncpa [#allocation3], 1 }
 0x113   :  { %317 = vsyncpa [#allocation3 + $0x1], 1 }

</bundles_post_ra>
